<compile_context>
chip_gen: v6e
topology: v6e:2x2x1
jax: 0.10.0
libtpu: 0.0.40
codegen_flags: <defaults>
</compile_context>

<pallas_src>
import math

import jax
import jax.numpy as jnp
from jax.experimental import pallas as pl
from jax.experimental.pallas import tpu as pltpu

DIMGROUP = 2  # `dimgroup` is an undefined global in model.py; fixed to 2.

_LANE_CAP = 2048  # max lanes per block (multiple of 128)


def rezero_kernel(x_ref, w_ref, o_ref):
    # x_ref: (TR, TL), w_ref: (TR, 1), o_ref: (TR, TL).
    # VPU broadcast multiply; mixed dtypes promote (matches torch), then cast
    # to the (promoted) output dtype.
    o_ref[...] = (x_ref[...] * w_ref[...]).astype(o_ref.dtype)


def _round_up(x, m):
    return ((x + m - 1) // m) * m


def _tpu_generation():
    """Best-effort TPU generation (5/6/7/...); None if it can't be determined."""
    try:
        kind = jax.devices()[0].device_kind.lower()
    except Exception:
        return None
    for tag, gen in (("v7", 7), ("v6", 6), ("v5", 5), ("v4", 4)):
        if tag in kind:
            return gen
    return None


def _tile(size, granule, target):
    """Largest legal tile <= target.

    Full extent is always legal.  Otherwise prefer the largest granule-aligned
    tile that evenly divides `size` (no ragged trailing block); fall back to a
    fixed granule-aligned tile (Pallas masks the partial trailing block).
    """
    if size <= target:
        return size
    top = max(granule, (target // granule) * granule)
    for cand in range(top, granule - 1, -granule):
        if size % cand == 0:
            return cand
    return top


def rezero(x, weight0, dim=1):
    """Pallas implementation of ReZero.forward (dim=1, grouped channel scale)."""
    assert dim == 1, "only dim=1 (channel dim) is implemented"
    assert x.ndim >= 2
    N, C = x.shape[0], x.shape[1]
    assert C % DIMGROUP == 0, "channel dim must be divisible by dimgroup"
    G = C // DIMGROUP
    spatial = math.prod(x.shape[2:]) if x.ndim > 2 else 1
    L = DIMGROUP * spatial          # contiguous per-group slab length
    R = N * G                       # one scale per (batch, group) row

    # Accept (G,) or (G, 1) weights.
    w = weight0.reshape(G, 1)
    out_dtype = jnp.result_type(x.dtype, w.dtype)   # torch promotion semantics

    # Lane-starved shapes: the fused XLA elementwise path matches or beats a
    # Pallas kernel whose lane utilization would be L/128.
    if L < 128:
        y = (x.reshape(N, G, -1) * w).reshape(x.shape)
        return y.astype(out_dtype)

    # Row-dense 2D view: row (n*G + g) is scaled by weight0[g].
    x2 = x.reshape(R, L)
    w2 = jnp.broadcast_to(w[None, :, :], (N, G, 1)).reshape(R, 1)

    # ---- dtype- and generation-aware tile targets (byte based) -------------
    x_isz = jnp.dtype(x.dtype).itemsize
    o_isz = jnp.dtype(out_dtype).itemsize
    budget_isz = max(x_isz, o_isz)            # budget on the widest streamed dtype
    sub_granule = max(8, 32 // min(x_isz, o_isz))   # 8 f32 / 16 bf16 / 32 int8

    gen = _tpu_generation()
    if gen is not None and gen >= 7:
        target_bytes = 8 << 20                # v7x: 3.2 TB/s HBM, amortize overhead
    elif gen == 6:
        target_bytes = 4 << 20                # v6e: fits 32 MiB default scoped VMEM
    else:
        target_bytes = 2 << 20                # v5e / unknown: fits 16 MiB default

    tl = _tile(L, 128, _LANE_CAP)
    tr_target = max(sub_granule,
                    ((target_bytes // (tl * budget_isz)) // sub_granule) * sub_granule)
    tr = _tile(R, sub_granule, tr_target)

    # v7x has 2 TensorCores: guarantee >=2 grid steps along a parallel axis.
    if gen is not None and gen >= 7:
        if pl.cdiv(R, tr) * pl.cdiv(L, tl) == 1:
            if R >= 2 * sub_granule:
                tr = _round_up(pl.cdiv(R, 2), sub_granule)
            elif L >= 256:
                tl = _round_up(pl.cdiv(L, 2), 128)

    grid = (pl.cdiv(R, tr), pl.cdiv(L, tl))

    # Estimated live VMEM (double-buffered in/out blocks + padded weight bufs);
    # raise the scoped limit only when the default 32 MiB would be exceeded
    # (only happens with the v7x 8 MiB target, well inside its 64 MiB VMEM).
    est_vmem = 2 * (tr * tl * x_isz + tr * tl * o_isz
                    + tr * 128 * jnp.dtype(w2.dtype).itemsize)
    cp_kwargs = dict(dimension_semantics=("parallel", "parallel"))
    if est_vmem > (28 << 20):
        cp_kwargs["vmem_limit_bytes"] = 48 << 20

    out2 = pl.pallas_call(
        rezero_kernel,
        out_shape=jax.ShapeDtypeStruct((R, L), out_dtype),
        grid=grid,
        in_specs=[
            pl.BlockSpec((tr, tl), lambda r, l: (r, l)),
            pl.BlockSpec((tr, 1), lambda r, l: (r, 0)),
        ],
        out_specs=pl.BlockSpec((tr, tl), lambda r, l: (r, l)),
        compiler_params=pltpu.CompilerParams(**cp_kwargs),
    )(x2, w2)

    return out2.reshape(x.shape)


if __name__ == "__main__":
    key = jax.random.PRNGKey(0)
    kx, kw = jax.random.split(key)

    N, C, H, W = 2, 4, 16, 16
    x = jax.random.normal(kx, (N, C, H, W), dtype=jnp.float32)

    # Module __init__ uses zeros (ReZero init).  Zeros would make the output
    # trivially all-zero, so for a meaningful correctness check we use small
    # deterministic values of the same shape (C // DIMGROUP, 1).
    weight0 = 0.1 * jax.random.normal(kw, (C // DIMGROUP, 1), dtype=jnp.float32)

    out = rezero(x, weight0)
    jax.block_until_ready(out)

    # Pure-JAX reference mirroring the PyTorch forward exactly.
    ref = (x.reshape(N, C // DIMGROUP, -1) * weight0).reshape(x.shape)
    assert out.shape == x.shape and out.dtype == ref.dtype
    assert jnp.allclose(out, ref, atol=1e-6, rtol=1e-6)

    print("KERNEL_OK")
</pallas_src>

<mosaic_0001>
module attributes {stable_mosaic.version = 11 : i64} {
  func.func @rezero_kernel(%arg0: i32, %arg1: i32, %arg2: memref<4x512xf32, #tpu.memory_space<vmem>>, %arg3: memref<4x1xf32, #tpu.memory_space<vmem>>, %arg4: memref<4x512xf32, #tpu.memory_space<vmem>>) attributes {dimension_semantics = [#tpu.dimension_semantics<parallel>, #tpu.dimension_semantics<parallel>], iteration_bounds = array<i64: 1, 1>, scalar_prefetch = 0 : i64, scratch_operands = 0 : i64, tpu.core_type = #tpu.core_type<tc>, window_params = [{transform_indices = @transform_0, window_bounds = array<i64: 4, 512>}, {transform_indices = @transform_1, window_bounds = array<i64: 4, 1>}, {transform_indices = @transform_2, window_bounds = array<i64: 4, 512>}]} {
    %c0 = arith.constant 0 : index
    %c0_0 = arith.constant 0 : index
    %0 = vector.load %arg2[%c0, %c0_0] : memref<4x512xf32, #tpu.memory_space<vmem>>, vector<4x512xf32>
    %c0_1 = arith.constant 0 : index
    %c0_2 = arith.constant 0 : index
    %1 = vector.load %arg3[%c0_1, %c0_2] : memref<4x1xf32, #tpu.memory_space<vmem>>, vector<4x1xf32>
    %2 = vector.broadcast %1 : vector<4x1xf32> to vector<4x512xf32>
    %3 = arith.mulf %0, %2 : vector<4x512xf32>
    %c0_3 = arith.constant 0 : index
    %c0_4 = arith.constant 0 : index
    %4 = vector.load %arg4[%c0_3, %c0_4] : memref<4x512xf32, #tpu.memory_space<vmem>>, vector<4x512xf32>
    tpu.vector_store %arg4[%c0_3, %c0_4], %3 {strides = array<i32>} : memref<4x512xf32, #tpu.memory_space<vmem>>, vector<4x512xf32>,
    return
  }
  func.func @transform_0(%arg0: i32, %arg1: i32) -> (i32, i32) {
    %c0_i32 = arith.constant 0 : i32
    return %arg0, %arg1 : i32, i32
  }
  func.func @transform_1(%arg0: i32, %arg1: i32) -> (i32, i32) {
    %c0_i32 = arith.constant 0 : i32
    %c0_i32_0 = arith.constant 0 : i32
    return %arg0, %c0_i32 : i32, i32
  }
  func.func @transform_2(%arg0: i32, %arg1: i32) -> (i32, i32) {
    %c0_i32 = arith.constant 0 : i32
    return %arg0, %arg1 : i32, i32
  }
}

</mosaic_0001>

<bundles_post_ra>
// kernel: tpu_custom_call.1
= control target key start
LH: loop header
LB: loop body
LE: loop exit
PB: predicated region body
PF: predicated region fallthrough
CT: control target
= control target key end

     0   :  { %7 = vsyncpa [#allocation3], 0  ;;  %s135_s0 = inlined_call_operand.hbm [shape: f32[4,512], index: 0, kind: input, shape index: {}]   ;;  %s136_s1 = inlined_call_operand.vmem [shape: f32[4,1], index: 1, kind: input, shape index: {}]   ;;  %s137_s2 = inlined_call_operand.hbm [shape: f32[4,512], index: 2, kind: output, shape index: {}]  }
   0x1   :  { %8 = vsyncpa [#allocation4], 0  ;;  %s107_s9 = smov [#allocation2]  }
   0x2   :  { %s15_s10 = sshll.u32 %s107_s9, 4  ;;  %s16_s10 = int_to_ptr.vmem [resolvable:$true] %s15_s10 }
   0x3   :  { %s71_s11 = scalar_lea.vmem %s16_s10, 256  ;;  %p76_p1 = scmp.lt.s32.totalorder %s16_s10, %s16_s10 }
   0x4   :  { %p72_p0 = scmp.ne.s32.totalorder %s16_s10, %s71_s11  ;;  %p77_p2 = scmp.lt.s32.totalorder %s71_s11, %s71_s11 }
   0x6   :  { %p78_p3 = por %p77_p2, %p76_p1 }
   0x8   :  { %p79_p4 = pnand %p78_p3, %p72_p0 }
   0xa   :  { %82 = shalt.err (!%p79_p4)
}
   0xb   :  { %18 = dma.hbm_to_vmem [thread:$0]  %s135_s0, 256, %s16_s10, [#allocation3]  }
   0xc   :  { %103 = dma.done.wait [#allocation3], 256  }
   0xd   :  { %104 = vsyncadd [#allocation3], 4294967040  ;;  %v108_v0 = vmov 0   ;;  %v26_v1 = vld [vmem:[%s136_s1] sm:$0xf]  ;;  %v34_v4 = vlaneseq  ;;  %v25_v10 = vld [vmem:[#allocation2 + $0x8] sm:$0xff] }
   0xe   :  { %62 = vset.pattern.permute.xlu0 %v108_v0  ;;  %v109_v2 = vmov 839922192   ;;  %v24_v9 = vld [vmem:[#allocation2] sm:$0xff]  ;;  %s110_s16 = smov [#allocation5]  }
   0xf   :  { %29 = vperm.xlu0 %62, %v26_v1   ;;  %v32_v3 = vunpack.c.l.s4 %v109_v2  ;;  %v35_v6 = vshrl.u32 %v34_v4, 7  ;;  %s49_s0 = sshll.u32 %s110_s16, 4  ;;  %s50_s0 = int_to_ptr.vmem [resolvable:$true] %s49_s0 }
  0x10   :  { %s83_s17 = scalar_lea.vmem %s50_s0, 256  ;;  %p88_p6 = scmp.lt.s32.totalorder %s50_s0, %s50_s0 }
  0x11   :  { %v33_v5 = vunpack.c.0.s8 %v32_v3  ;;  %p84_p5 = scmp.ne.s32.totalorder %s50_s0, %s83_s17  ;;  %p89_p7 = scmp.lt.s32.totalorder %s83_s17, %s83_s17 }
  0x13   :  { %v36_v7 = vsub.s32 %v33_v5, %v35_v6  ;;  %p90_p8 = por %p89_p7, %p88_p6 }
  0x15   :  { %p91_p9 = pnand %p90_p8, %p84_p5 }
  0x8a   :  { %v30_v8 = vpop.permute.xlu0 %29 }
  0x8b   :  { %v37_v11 = vrot.slane %v30_v8, %v36_v7 }
  0x8d   :  { %v39_v12 = vmul.f32 %v37_v11, %v24_v9  ;;  %v40_v13 = vmul.f32 %v37_v11, %v25_v10 }
  0x8f   :  { %41 = vst [vmem:[#allocation5] sm:$0xff] %v39_v12  ;;  %42 = vst [vmem:[#allocation5 + $0x8] sm:$0xff] %v40_v13 }
  0x90   :  { %94 = shalt.err (!%p91_p9)
}
  0x91   :  { %52 = dma.vmem_to_hbm [thread:$0]  %s50_s0, 256, %s137_s2, [#allocation4]  }
  0x92   :  { %105 = dma.done.wait [#allocation4], 256  }
  0x93   :  { %106 = vsyncadd [#allocation4], 4294967040 }
  0x94   :  { %56 = vsyncpa [#allocation3], 1 }
  0x95   :  { %57 = vsyncpa [#allocation4], 1 }

</bundles_post_ra>
